<compile_context>
chip_gen: v7x
topology: tpu7x:2x2x1
jax: 0.10.0
libtpu: 0.0.40
codegen_flags: <defaults>
</compile_context>

<pallas_src>
import jax
import jax.numpy as jnp
from jax import lax
from jax.experimental import pallas as pl
from jax.experimental.pallas import tpu as pltpu


_SQRT_HALF = 0.7071067811865476  # 1 / sqrt(2)


def _round_up(x, m):
    return ((x + m - 1) // m) * m


def _ffn_kernel(x_ref, w1_ref, w2_ref, o_ref, acc_ref):
    # x_ref  : (tm, d_model)    token tile
    # w1_ref : (tf, d_model)    d_ff-slice of w1 (nn.Linear layout (d_ff, d_model))
    # w2_ref : (d_model, tf)    d_ff-slice of w2 (nn.Linear layout (d_model, d_ff))
    # o_ref  : (tm, d_model)    output tile (resident across the d_ff axis)
    # acc_ref: (tm, d_model) f32 accumulator scratch
    f = pl.program_id(1)

    @pl.when(f == 0)
    def _():
        acc_ref[...] = jnp.zeros_like(acc_ref)

    # h = x @ w1_tile.T -> (tm, tf); MXU with fp32 accumulation, inputs stay
    # in their native dtype (bf16 feeds the MXU directly).
    h = lax.dot_general(
        x_ref[...], w1_ref[...],
        dimension_numbers=(((1,), (1,)), ((), ())),
        preferred_element_type=jnp.float32)

    # Exact erf-GELU, fp32 (matches the PyTorch module).
    g = (lax.erf(h * jnp.float32(_SQRT_HALF)) + 1.0) * h * 0.5

    # Partial y = GELU(h) @ w2_tile.T -> (tm, d_model); accumulate over d_ff.
    acc_ref[...] += lax.dot_general(
        g.astype(w2_ref.dtype), w2_ref[...],
        dimension_numbers=(((1,), (1,)), ((), ())),
        preferred_element_type=jnp.float32)

    @pl.when(f == pl.num_programs(1) - 1)
    def _():
        o_ref[...] = acc_ref[...].astype(o_ref.dtype)


def ffn_forward(x, w1, w2, *, tm=256, tf=512):
    """y = GELU(x @ w1.T) @ w2.T

    x : (..., d_model)
    w1: (d_ff, d_model)   nn.Linear(d_model, d_ff).weight
    w2: (d_model, d_ff)   nn.Linear(d_ff, d_model).weight
    """
    d_ff, d_model = w1.shape
    assert w2.shape == (d_model, d_ff)
    orig_shape = x.shape
    assert orig_shape[-1] == d_model

    x2 = x.reshape(-1, d_model)
    n = x2.shape[0]

    # Sublane packing of the token axis depends on element width.
    sub = {4: 8, 2: 16, 1: 32}.get(jnp.dtype(x2.dtype).itemsize, 8)

    # Token tile: large by default, capped (and aligned) for small inputs.
    tm_eff = _round_up(min(tm, _round_up(n, sub)), sub)
    n_pad = _round_up(n, tm_eff)

    # d_ff reduction tile (lane-aligned).
    tf_eff = _round_up(min(tf, _round_up(d_ff, 128)), 128)
    dff_pad = _round_up(d_ff, tf_eff)

    # Lane-dense output: pad d_model to a multiple of 128.
    dm_pad = _round_up(d_model, 128)

    if n_pad != n or dm_pad != d_model:
        x2 = jnp.pad(x2, ((0, n_pad - n), (0, dm_pad - d_model)))
    if dff_pad != d_ff or dm_pad != d_model:
        # Zero padding is exact: GELU(0) = 0 and there are no biases.
        w1 = jnp.pad(w1, ((0, dff_pad - d_ff), (0, dm_pad - d_model)))
        w2 = jnp.pad(w2, ((0, dm_pad - d_model), (0, dff_pad - d_ff)))

    grid = (n_pad // tm_eff, dff_pad // tf_eff)

    # Rough VMEM budget (double-buffered tiles + fp32 accumulator); raise the
    # scoped limit with headroom, but stay well under v7x's 64 MiB physical.
    itemsize = jnp.dtype(x2.dtype).itemsize
    est = (2 * itemsize * (tm_eff * dm_pad        # x tile
                           + tf_eff * dm_pad      # w1 tile
                           + dm_pad * tf_eff      # w2 tile
                           + tm_eff * dm_pad)     # out tile
           + 4 * tm_eff * dm_pad)                 # f32 accumulator
    vmem_limit = int(min(max(est + est // 2, 32 * 1024 * 1024),
                         56 * 1024 * 1024))

    out = pl.pallas_call(
        _ffn_kernel,
        out_shape=jax.ShapeDtypeStruct((n_pad, dm_pad), x.dtype),
        grid_spec=pltpu.PrefetchScalarGridSpec(
            num_scalar_prefetch=0,
            grid=grid,
            in_specs=[
                pl.BlockSpec((tm_eff, dm_pad), lambda i, f: (i, 0)),
                pl.BlockSpec((tf_eff, dm_pad), lambda i, f: (f, 0)),
                pl.BlockSpec((dm_pad, tf_eff), lambda i, f: (0, f)),
            ],
            out_specs=pl.BlockSpec((tm_eff, dm_pad), lambda i, f: (i, 0)),
            scratch_shapes=[pltpu.VMEM((tm_eff, dm_pad), jnp.float32)],
        ),
        compiler_params=pltpu.CompilerParams(
            dimension_semantics=("parallel", "arbitrary"),
            vmem_limit_bytes=vmem_limit),
    )(x2, w1, w2)

    if n_pad != n or dm_pad != d_model:
        out = out[:n, :d_model]
    return out.reshape(orig_shape)


def _reference(x, w1, w2):
    h = jnp.einsum("...d,fd->...f", x, w1)
    g = (lax.erf(h * jnp.float32(_SQRT_HALF)) + 1.0) * h * 0.5
    return jnp.einsum("...f,df->...d", g, w2)


if __name__ == "__main__":
    key = jax.random.PRNGKey(0)

    # --- small test matching the module's toy shapes ---
    batch, seq, d_model, d_ff = 2, 8, 32, 128
    kx, k1, k2, key = jax.random.split(key, 4)
    x = jax.random.normal(kx, (batch, seq, d_model), dtype=jnp.float32)
    w1 = jax.random.normal(k1, (d_ff, d_model), dtype=jnp.float32) * 0.05
    w2 = jax.random.normal(k2, (d_model, d_ff), dtype=jnp.float32) * 0.05

    y = jax.block_until_ready(ffn_forward(x, w1, w2))
    y_ref = _reference(x, w1, w2)
    assert y.shape == (batch, seq, d_model)
    assert jnp.allclose(y, y_ref, atol=1e-4, rtol=1e-4)

    # --- multi-tile test: exercises token tiling, d_ff reduction tiling and
    #     d_model lane padding (odd sizes on purpose) ---
    batch, seq, d_model, d_ff = 1, 272, 192, 384
    kx, k1, k2, key = jax.random.split(key, 4)
    x = jax.random.normal(kx, (batch, seq, d_model), dtype=jnp.float32)
    w1 = jax.random.normal(k1, (d_ff, d_model), dtype=jnp.float32) * 0.05
    w2 = jax.random.normal(k2, (d_model, d_ff), dtype=jnp.float32) * 0.05

    y = jax.block_until_ready(ffn_forward(x, w1, w2, tm=128, tf=128))
    y_ref = _reference(x, w1, w2)
    assert y.shape == (batch, seq, d_model)
    assert jnp.allclose(y, y_ref, atol=1e-4, rtol=1e-4)

    print("KERNEL_OK")
</pallas_src>

<mosaic_0001>
module attributes {stable_mosaic.version = 11 : i64} {
  func.func @_ffn_kernel(%arg0: i32, %arg1: i32, %arg2: memref<16x128xf32, #tpu.memory_space<vmem>>, %arg3: memref<128x128xf32, #tpu.memory_space<vmem>>, %arg4: memref<128x128xf32, #tpu.memory_space<vmem>>, %arg5: memref<16x128xf32, #tpu.memory_space<vmem>>, %arg6: memref<16x128xf32, #tpu.memory_space<vmem>>) attributes {dimension_semantics = [#tpu.dimension_semantics<parallel>, #tpu.dimension_semantics<arbitrary>], iteration_bounds = array<i64: 1, 1>, scalar_prefetch = 0 : i64, scratch_operands = 1 : i64, tpu.core_type = #tpu.core_type<tc>, window_params = [{transform_indices = @transform_0, window_bounds = array<i64: 16, 128>}, {transform_indices = @transform_1, window_bounds = array<i64: 128, 128>}, {transform_indices = @transform_2, window_bounds = array<i64: 128, 128>}, {transform_indices = @transform_3, window_bounds = array<i64: 16, 128>}]} {
    %c0_i32 = arith.constant 0 : i32
    %0 = arith.cmpi eq, %arg1, %c0_i32 : i32
    %1 = arith.extui %0 : i1 to i32
    %c0_i32_0 = arith.constant 0 : i32
    %2 = arith.cmpi ne, %1, %c0_i32_0 : i32
    scf.if %2 {
      %cst_16 = arith.constant 0.000000e+00 : f32
      %22 = vector.broadcast %cst_16 : f32 to vector<16x128xf32>
      %c0_17 = arith.constant 0 : index
      %c0_18 = arith.constant 0 : index
      %23 = vector.load %arg6[%c0_17, %c0_18] : memref<16x128xf32, #tpu.memory_space<vmem>>, vector<16x128xf32>
      tpu.vector_store %arg6[%c0_17, %c0_18], %22 {strides = array<i32>} : memref<16x128xf32, #tpu.memory_space<vmem>>, vector<16x128xf32>,
    } else {
    }
    %c0 = arith.constant 0 : index
    %c0_1 = arith.constant 0 : index
    %3 = vector.load %arg2[%c0, %c0_1] : memref<16x128xf32, #tpu.memory_space<vmem>>, vector<16x128xf32>
    %c0_2 = arith.constant 0 : index
    %c0_3 = arith.constant 0 : index
    %4 = vector.load %arg3[%c0_2, %c0_3] : memref<128x128xf32, #tpu.memory_space<vmem>>, vector<128x128xf32>
    %cst = arith.constant dense<0.000000e+00> : vector<16x128xf32>
    %5 = tpu.matmul %3, %4, %cst {dimension_numbers = #tpu.dot_dimension_numbers<[1], [1], [0], [0], [0, 0, 1, 0], [], []>} : vector<16x128xf32>, vector<128x128xf32>, vector<16x128xf32> -> vector<16x128xf32>
    %cst_4 = arith.constant 0.707106769 : f32
    %6 = vector.broadcast %cst_4 : f32 to vector<16x128xf32>
    %7 = arith.mulf %5, %6 : vector<16x128xf32>
    %8 = math.erf %7 : vector<16x128xf32>
    %cst_5 = arith.constant 1.000000e+00 : f32
    %9 = vector.broadcast %cst_5 : f32 to vector<16x128xf32>
    %10 = arith.addf %8, %9 : vector<16x128xf32>
    %11 = arith.mulf %10, %5 : vector<16x128xf32>
    %cst_6 = arith.constant 5.000000e-01 : f32
    %12 = vector.broadcast %cst_6 : f32 to vector<16x128xf32>
    %13 = arith.mulf %11, %12 : vector<16x128xf32>
    %c0_7 = arith.constant 0 : index
    %c0_8 = arith.constant 0 : index
    %14 = vector.load %arg6[%c0_7, %c0_8] : memref<16x128xf32, #tpu.memory_space<vmem>>, vector<16x128xf32>
    %c0_9 = arith.constant 0 : index
    %c0_10 = arith.constant 0 : index
    %15 = vector.load %arg4[%c0_9, %c0_10] : memref<128x128xf32, #tpu.memory_space<vmem>>, vector<128x128xf32>
    %cst_11 = arith.constant dense<0.000000e+00> : vector<16x128xf32>
    %16 = tpu.matmul %13, %15, %cst_11 {dimension_numbers = #tpu.dot_dimension_numbers<[1], [1], [0], [0], [0, 0, 1, 0], [], []>} : vector<16x128xf32>, vector<128x128xf32>, vector<16x128xf32> -> vector<16x128xf32>
    %17 = arith.addf %14, %16 : vector<16x128xf32>
    %c0_12 = arith.constant 0 : index
    %c0_13 = arith.constant 0 : index
    %18 = vector.load %arg6[%c0_12, %c0_13] : memref<16x128xf32, #tpu.memory_space<vmem>>, vector<16x128xf32>
    tpu.vector_store %arg6[%c0_12, %c0_13], %17 {strides = array<i32>} : memref<16x128xf32, #tpu.memory_space<vmem>>, vector<16x128xf32>,
    %c0_i32_14 = arith.constant 0 : i32
    %19 = arith.cmpi eq, %arg1, %c0_i32_14 : i32
    %20 = arith.extui %19 : i1 to i32
    %c0_i32_15 = arith.constant 0 : i32
    %21 = arith.cmpi ne, %20, %c0_i32_15 : i32
    scf.if %21 {
      %c0_16 = arith.constant 0 : index
      %c0_17 = arith.constant 0 : index
      %22 = vector.load %arg6[%c0_16, %c0_17] : memref<16x128xf32, #tpu.memory_space<vmem>>, vector<16x128xf32>
      %c0_18 = arith.constant 0 : index
      %c0_19 = arith.constant 0 : index
      %23 = vector.load %arg5[%c0_18, %c0_19] : memref<16x128xf32, #tpu.memory_space<vmem>>, vector<16x128xf32>
      tpu.vector_store %arg5[%c0_18, %c0_19], %22 {strides = array<i32>} : memref<16x128xf32, #tpu.memory_space<vmem>>, vector<16x128xf32>,
    } else {
    }
    return
  }
  func.func @transform_0(%arg0: i32, %arg1: i32) -> (i32, i32) {
    %c0_i32 = arith.constant 0 : i32
    %c0_i32_0 = arith.constant 0 : i32
    return %arg0, %c0_i32 : i32, i32
  }
  func.func @transform_1(%arg0: i32, %arg1: i32) -> (i32, i32) {
    %c0_i32 = arith.constant 0 : i32
    %c0_i32_0 = arith.constant 0 : i32
    return %arg1, %c0_i32 : i32, i32
  }
  func.func @transform_2(%arg0: i32, %arg1: i32) -> (i32, i32) {
    %c0_i32 = arith.constant 0 : i32
    %c0_i32_0 = arith.constant 0 : i32
    return %c0_i32, %arg1 : i32, i32
  }
  func.func @transform_3(%arg0: i32, %arg1: i32) -> (i32, i32) {
    %c0_i32 = arith.constant 0 : i32
    %c0_i32_0 = arith.constant 0 : i32
    return %arg0, %c0_i32 : i32, i32
  }
}

</mosaic_0001>

<bundles_post_ra>
// kernel: tpu_custom_call.1
= control target key start
LH: loop header
LB: loop body
LE: loop exit
PB: predicated region body
PF: predicated region fallthrough
CT: control target
= control target key end

     0   :  { %8 = vsyncpa [#allocation4], 0  ;;  %s654_s0 = inlined_call_operand.hbm [shape: f32[16,128], index: 0, kind: input, shape index: {}]   ;;  %s655_s1 = inlined_call_operand.hbm [shape: f32[128,128], index: 1, kind: input, shape index: {}]   ;;  %s656_s2 = inlined_call_operand.hbm [shape: f32[128,128], index: 2, kind: input, shape index: {}]   ;;  %s657_s3 = inlined_call_operand.hbm [shape: f32[16,128], index: 3, kind: output, shape index: {}]  }
   0x1   :  { %9 = vsyncpa [#allocation7], 0 }
   0x2   :  { %10 = vsyncpa [#allocation5], 0  ;;  %s561_s12 = smov [#allocation6]   ;;  %s562_s14 = smov [#allocation3]  }
   0x3   :  { %s28_s13 = sshll.u32 %s561_s12, 4  ;;  %s16_s15 = sshll.u32 %s562_s14, 4  ;;  %s29_s13 = int_to_ptr.vmem [resolvable:$true] %s28_s13  ;;  %s587_s15 = int_to_ptr.vmem [resolvable:$true] %s16_s15 }
   0x4   :  { %s467_s18 = scalar_lea.hbm %s655_s1, 2048 }
   0x5   :  { %p468_p0 = scmp.ne.s32.totalorder %s655_s1, %s467_s18  ;;  %p471_p1 = scmp.lt.u32.totalorder %s467_s18, %s655_s1 }
   0x7   :  { %p473_p2 = pnand %p471_p1, %p468_p0 }
   0x9   :  { %476 = shalt.err (!%p473_p2)
}
   0xa   :  { %s477_s23 = scalar_lea.vmem %s29_s13, 2048  ;;  %p482_p4 = scmp.lt.s32.totalorder %s29_s13, %s29_s13 }
   0xb   :  { %p478_p3 = scmp.ne.s32.totalorder %s29_s13, %s477_s23  ;;  %p483_p5 = scmp.lt.s32.totalorder %s477_s23, %s477_s23 }
   0xd   :  { %p484_p6 = por %p483_p5, %p482_p4 }
   0xf   :  { %p485_p7 = pnand %p484_p6, %p478_p3 }
  0x11   :  { %488 = shalt.err (!%p485_p7)
}
  0x12   :  { %s563_s24 = smov 128   ;;  %s564_s25 = smov 8  }
  0x13   :  { %34 = dma.hbm_to_vmem [thread:$0]  %s655_s1, 2048, %s29_s13, [#allocation7], %s563_s24, %s563_s24, %s564_s25  }
  0x14   :  { %s489_s30 = scalar_lea.hbm %s654_s0, 256 }
  0x15   :  { %p490_p8 = scmp.ne.s32.totalorder %s654_s0, %s489_s30  ;;  %p493_p9 = scmp.lt.u32.totalorder %s489_s30, %s654_s0 }
  0x17   :  { %p495_p10 = pnand %p493_p9, %p490_p8 }
  0x19   :  { %498 = shalt.err (!%p495_p10)
}
  0x1a   :  { %s499_s8 = scalar_lea.vmem %s587_s15, 256  ;;  %p504_p12 = scmp.lt.s32.totalorder %s587_s15, %s587_s15 }
  0x1b   :  { %p500_p11 = scmp.ne.s32.totalorder %s587_s15, %s499_s8  ;;  %p505_p13 = scmp.lt.s32.totalorder %s499_s8, %s499_s8 }
  0x1d   :  { %p506_p0 = por %p505_p13, %p504_p12 }
  0x1f   :  { %p507_p1 = pnand %p506_p0, %p500_p11 }
  0x21   :  { %510 = shalt.err (!%p507_p1)
}
  0x22   :  { %22 = dma.hbm_to_vmem [thread:$0]  %s654_s0, 256, %s587_s15, [#allocation4], %s563_s24, %s563_s24, %s564_s25  }
  0x23   :  { %s565_s10 = smov [#allocation8]   ;;  %s511_s14 = scalar_lea.hbm %s656_s2, 2048 }
  0x24   :  { %s40_s11 = sshll.u32 %s565_s10, 4  ;;  %p512_p2 = scmp.ne.s32.totalorder %s656_s2, %s511_s14  ;;  %s41_s11 = int_to_ptr.vmem [resolvable:$true] %s40_s11 }
  0x25   :  { %p515_p3 = scmp.lt.u32.totalorder %s511_s14, %s656_s2 }
  0x27   :  { %p517_p4 = pnand %p515_p3, %p512_p2 }
  0x29   :  { %520 = shalt.err (!%p517_p4)
}
  0x2a   :  { %s521_s20 = scalar_lea.vmem %s41_s11, 2048  ;;  %p526_p6 = scmp.lt.s32.totalorder %s41_s11, %s41_s11 }
  0x2b   :  { %p522_p5 = scmp.ne.s32.totalorder %s41_s11, %s521_s20  ;;  %p527_p7 = scmp.lt.s32.totalorder %s521_s20, %s521_s20 }
  0x2d   :  { %p528_p8 = por %p527_p7, %p526_p6 }
  0x2f   :  { %p529_p9 = pnand %p528_p8, %p522_p5 }
  0x31   :  { %532 = shalt.err (!%p529_p9)
}
  0x32   :  { %46 = dma.hbm_to_vmem [thread:$0]  %s656_s2, 2048, %s41_s11, [#allocation7], %s563_s24, %s563_s24, %s564_s25  }
  0x33   :  { %555 = dma.done.wait [#allocation4], 256  }
  0x34   :  { %556 = vsyncadd [#allocation4], 4294967040 }
  0x35   :  { %557 = dma.done.wait [#allocation7], 4096  }
  0x36   :  { %558 = vsyncadd [#allocation7], 4294963200  ;;  %v64_v0 = vld [vmem:[#allocation6] sm:$0xff]  ;;  %v65_v1 = vld [vmem:[#allocation6 + $0x8] sm:$0xff]  ;;  %s566_s2 = smov [#allocation9]  }
  0x37   :  { %v66_v2 = vld [vmem:[#allocation6 + $0x10] sm:$0xff]  ;;  %v393_v3 = vpack.c.bf16 %v65_v1, %v64_v0  ;;  %v67_v4 = vld [vmem:[#allocation6 + $0x18] sm:$0xff]  ;;  %v68_v6 = vld [vmem:[#allocation6 + $0x20] sm:$0xff]  ;;  %s274_s21 = sshll.u32 %s566_s2, 4  ;;  %s275_s21 = int_to_ptr.vmem [resolvable:$true] %s274_s21 }
  0x38   :  { %v397_v5 = vpack.c.bf16 %v67_v4, %v66_v2  ;;  %v69_v7 = vld [vmem:[#allocation6 + $0x28] sm:$0xff]  ;;  %v62_v8 = vld [vmem:[#allocation3] sm:$0xff]  ;;  %v167_v9 = vld [vmem:[#allocation8] sm:$0xff]  ;;  %s533_s22 = scalar_lea.vmem %s275_s21, 256  ;;  %p538_p11 = scmp.lt.s32.totalorder %s275_s21, %s275_s21 }
  0x39   :  { %394 = vmatprep.subr.bf16.mxu0 %v393_v3  ;;  %355 = vmatprep.mubr.f32.mxu0 %v62_v8  ;;  %v168_v10 = vld [vmem:[#allocation8 + $0x8] sm:$0xff]  ;;  %v169_v11 = vld [vmem:[#allocation8 + $0x10] sm:$0xff]  ;;  %v170_v13 = vld [vmem:[#allocation8 + $0x18] sm:$0xff]  ;;  %v401_v15 = vpack.c.bf16 %v69_v7, %v68_v6  ;;  %p534_p10 = scmp.ne.s32.totalorder %s275_s21, %s533_s22  ;;  %p539_p12 = scmp.lt.s32.totalorder %s533_s22, %s533_s22 }
  0x3a   :  { %396 = vmatpush3.bf16.xpose.msra.mxu0 %v393_v3  ;;  %v425_v12 = vpack.c.bf16 %v168_v10, %v167_v9  ;;  %v429_v14 = vpack.c.bf16 %v170_v13, %v169_v11  ;;  %v171_v16 = vld [vmem:[#allocation8 + $0x20] sm:$0xff]  ;;  %v172_v17 = vld [vmem:[#allocation8 + $0x28] sm:$0xff]  ;;  %v70_v18 = vld [vmem:[#allocation6 + $0x30] sm:$0xff] }
  0x3b   :  { %398 = vmatprep.subr.bf16.mxu0 %v397_v5  ;;  %v71_v19 = vld [vmem:[#allocation6 + $0x38] sm:$0xff]  ;;  %v433_v20 = vpack.c.bf16 %v172_v17, %v171_v16  ;;  %v173_v22 = vld [vmem:[#allocation8 + $0x30] sm:$0xff]  ;;  %v72_v24 = vld [vmem:[#allocation6 + $0x40] sm:$0xff]  ;;  %p540_p13 = por %p539_p12, %p538_p11 }
  0x3c   :  { %426 = vmatprep.subr.bf16.mxu1 %v425_v12  ;;  %v405_v21 = vpack.c.bf16 %v71_v19, %v70_v18  ;;  %v174_v23 = vld [vmem:[#allocation8 + $0x38] sm:$0xff]  ;;  %v73_v25 = vld [vmem:[#allocation6 + $0x48] sm:$0xff]  ;;  %v175_v28 = vld [vmem:[#allocation8 + $0x40] sm:$0xff] }
  0x3d   :  { %428 = vmatpush3.bf16.xpose.msra.mxu1 %v425_v12  ;;  %v437_v26 = vpack.c.bf16 %v174_v23, %v173_v22  ;;  %v409_v27 = vpack.c.bf16 %v73_v25, %v72_v24  ;;  %v176_v29 = vld [vmem:[#allocation8 + $0x48] sm:$0xff]  ;;  %v74_v30 = vld [vmem:[#allocation6 + $0x50] sm:$0xff]  ;;  %v75_v31 = vld [vmem:[#allocation6 + $0x58] sm:$0xff]  ;;  %p541_p0 = pnand %p540_p13, %p534_p10 }
  0x3e   :  { %430 = vmatprep.subr.bf16.mxu1 %v429_v14  ;;  %v441_v32 = vpack.c.bf16 %v176_v29, %v175_v28  ;;  %v413_v33 = vpack.c.bf16 %v75_v31, %v74_v30  ;;  %v177_v34 = vld [vmem:[#allocation8 + $0x50] sm:$0xff]  ;;  %v178_v35 = vld [vmem:[#allocation8 + $0x58] sm:$0xff]  ;;  %v76_v36 = vld [vmem:[#allocation6 + $0x60] sm:$0xff] }
  0x3f   :  { %v77_v37 = vld [vmem:[#allocation6 + $0x68] sm:$0xff]  ;;  %v445_v38 = vpack.c.bf16 %v178_v35, %v177_v34  ;;  %v78_v40 = vld [vmem:[#allocation6 + $0x70] sm:$0xff]  ;;  %v79_v41 = vld [vmem:[#allocation6 + $0x78] sm:$0xff] }
  0x40   :  { %v417_v39 = vpack.c.bf16 %v77_v37, %v76_v36  ;;  %v421_v42 = vpack.c.bf16 %v79_v41, %v78_v40  ;;  %v63_v43 = vld [vmem:[#allocation3 + $0x8] sm:$0xff]  ;;  %v179_v44 = vld [vmem:[#allocation8 + $0x60] sm:$0xff]  ;;  %v180_v45 = vld [vmem:[#allocation8 + $0x68] sm:$0xff] }
  0x41   :  { %v449_v46 = vpack.c.bf16 %v180_v45, %v179_v44  ;;  %v181_v47 = vld [vmem:[#allocation8 + $0x70] sm:$0xff]  ;;  %v182_v48 = vld [vmem:[#allocation8 + $0x78] sm:$0xff] }
  0x42   :  { %400 = vmatpush3.bf16.xpose.msra.mxu0 %v397_v5  ;;  %v453_v49 = vpack.c.bf16 %v182_v48, %v181_v47 }
  0x43   :  { %402 = vmatprep.subr.bf16.mxu0 %v401_v15 }
  0x45   :  { %432 = vmatpush3.bf16.xpose.msra.mxu1 %v429_v14 }
  0x46   :  { %434 = vmatprep.subr.bf16.mxu1 %v433_v20 }
  0x4a   :  { %404 = vmatpush3.bf16.xpose.msra.mxu0 %v401_v15 }
  0x4b   :  { %406 = vmatprep.subr.bf16.mxu0 %v405_v21 }
  0x4d   :  { %436 = vmatpush3.bf16.xpose.msra.mxu1 %v433_v20 }
  0x4e   :  { %438 = vmatprep.subr.bf16.mxu1 %v437_v26 }
  0x52   :  { %408 = vmatpush3.bf16.xpose.msra.mxu0 %v405_v21 }
  0x53   :  { %410 = vmatprep.subr.bf16.mxu0 %v409_v27 }
  0x55   :  { %440 = vmatpush3.bf16.xpose.msra.mxu1 %v437_v26 }
  0x56   :  { %442 = vmatprep.subr.bf16.mxu1 %v441_v32 }
  0x5a   :  { %412 = vmatpush3.bf16.xpose.msra.mxu0 %v409_v27 }
  0x5b   :  { %414 = vmatprep.subr.bf16.mxu0 %v413_v33 }
  0x5d   :  { %444 = vmatpush3.bf16.xpose.msra.mxu1 %v441_v32 }
  0x5e   :  { %446 = vmatprep.subr.bf16.mxu1 %v445_v38 }
  0x62   :  { %416 = vmatpush3.bf16.xpose.msra.mxu0 %v413_v33 }
  0x63   :  { %418 = vmatprep.subr.bf16.mxu0 %v417_v39 }
  0x65   :  { %448 = vmatpush3.bf16.xpose.msra.mxu1 %v445_v38 }
  0x66   :  { %450 = vmatprep.subr.bf16.mxu1 %v449_v46 }
  0x6a   :  { %420 = vmatpush3.bf16.xpose.msra.mxu0 %v417_v39 }
  0x6b   :  { %422 = vmatprep.subr.bf16.mxu0 %v421_v42 }
  0x6d   :  { %452 = vmatpush3.bf16.xpose.msra.mxu1 %v449_v46 }
  0x6e   :  { %454 = vmatprep.subr.bf16.mxu1 %v453_v49 }
  0x72   :  { %424 = vmatpush3.bf16.xpose.msra.mxu0 %v421_v42 }
  0x75   :  { %456 = vmatpush3.bf16.xpose.msra.mxu1 %v453_v49 }
  0x79   :  { %356 = vmatmul.mubr.f32.vlgmr.msra.gmra.mrb[0].mxu0 %v63_v43 }
 0x14c   :  { %v357_v50 = vpop.f32.mrb[0].mxu0 }
 0x14d   :  { %v156_v51 = vmul.f32 0.70710677, %v357_v50  ;;  %v146_v52 = vpop.f32.mrb[1].mxu0 }
 0x14e   :  { %v155_v53 = vmul.f32 0.70710677, %v146_v52 }
 0x14f   :  { %463 = verf.f32 %v156_v51 }
 0x150   :  { %465 = verf.f32 %v155_v53 }
 0x159   :  { %v464_v54 = vpop.eup %463 }
 0x15a   :  { %v466_v55 = vpop.eup %465  ;;  %v160_v56 = vadd.f32 1.0, %v464_v54 }
 0x15b   :  { %v159_v57 = vadd.f32 1.0, %v466_v55 }
 0x15c   :  { %v162_v58 = vmul.f32 %v357_v50, %v160_v56 }
 0x15d   :  { %v161_v59 = vmul.f32 %v159_v57, %v146_v52 }
 0x15e   :  { %v164_v61 = vmul.f32 0.5, %v162_v58 }
 0x15f   :  { %v163_v60 = vmul.f32 0.5, %v161_v59 }
 0x161   :  { %390 = vmatprep.mubr.f32.mxu1 %v163_v60 }
 0x162   :  { %391 = vmatmul.mubr.f32.vlgmr.msra.gmra.mrb[0].mxu1 %v164_v61 }
 0x235   :  { %v392_v62 = vpop.f32.mrb[0].mxu1 }
 0x236   :  { %268 = vst [vmem:[#allocation9 + $0x8] sm:$0xff] %v392_v62  ;;  %v249_v63 = vpop.f32.mrb[1].mxu1 }
 0x237   :  { %267 = vst [vmem:[#allocation9] sm:$0xff] %v249_v63 }
 0x238   :  { %544 = shalt.err (!%p541_p0)
}
 0x239   :  { %s545_s27 = scalar_lea.hbm %s657_s3, 256 }
 0x23a   :  { %p546_p1 = scmp.ne.s32.totalorder %s657_s3, %s545_s27  ;;  %p549_p2 = scmp.lt.u32.totalorder %s545_s27, %s657_s3 }
 0x23c   :  { %p551_p3 = pnand %p549_p2, %p546_p1 }
 0x23e   :  { %554 = shalt.err (!%p551_p3)
}
 0x23f   :  { %280 = dma.vmem_to_hbm [thread:$0]  %s275_s21, 256, %s657_s3, [#allocation5], %s563_s24, %s563_s24, %s564_s25  }
 0x240   :  { %559 = dma.done.wait [#allocation5], 256  }
 0x241   :  { %560 = vsyncadd [#allocation5], 4294967040 }
 0x242   :  { %284 = vsyncpa [#allocation4], 1 }
 0x243   :  { %285 = vsyncpa [#allocation7], 1 }
 0x244   :  { %286 = vsyncpa [#allocation5], 1 }

</bundles_post_ra>
